<compile_context>
chip_gen: v6e
topology: v6e:2x2x1
jax: 0.10.0
libtpu: 0.0.40
codegen_flags: <defaults>
</compile_context>

<pallas_src>
import functools

import jax
import jax.numpy as jnp
from jax.experimental import pallas as pl
from jax.experimental.pallas import tpu as pltpu

_MIB = 1024 * 1024
_MAX_FLAT_N = 2048   # flattened-DFT path limit (DFT matrix must fit in VMEM)


def _round_up(x, m):
    return ((x + m - 1) // m) * m


def _detect_buffered_support():
    """API-level check for pl.Buffered / BlockSpec(pipeline_mode=...)."""
    if not hasattr(pl, "Buffered"):
        return False
    try:
        pl.BlockSpec((8, 128), lambda i: (0, 0), pipeline_mode=pl.Buffered(1))
    except TypeError:
        return False
    return True


_HAS_BUFFERED = _detect_buffered_support()


def _chip_config():
    """Generation-aware (vmem_budget, vmem_limit, ncores)."""
    kind = ""
    try:
        kind = str(jax.devices()[0].device_kind).lower()
    except Exception:  # no device metadata -> conservative defaults below
        kind = ""
    vmem_phys = 0
    try:
        vmem_phys = int(getattr(pltpu.get_tpu_info(), "vmem_capacity_bytes", 0))
    except Exception:  # hardware-query helper unavailable -> device_kind heuristic
        vmem_phys = 0
    is_v7 = ("v7" in kind) or ("7x" in kind)
    if vmem_phys <= 0:
        vmem_phys = (64 if is_v7 else 128) * _MIB
    if vmem_phys <= 64 * _MIB:           # v7x-class: 64 MiB VMEM per TensorCore
        budget, limit = 48 * _MIB, 56 * _MIB
    else:                                # v5e / v6e: 128 MiB VMEM
        budget, limit = 100 * _MIB, 112 * _MIB
    ncores = 2 if is_v7 else 1           # 2 TensorCores per chip only on v7x
    return budget, limit, ncores


def _l1fft_kernel(pred_ref, targ_ref, f2_ref, pix_out_ref, freq_out_ref,
                  pix_acc, freq_acc, *, inner_axis, n, tb):
    """One grid step: TB flattened (H*W)-pixel rows."""
    i = pl.program_id(inner_axis)

    @pl.when(i == 0)
    def _init():
        pix_acc[...] = jnp.zeros_like(pix_acc)
        freq_acc[...] = jnp.zeros_like(freq_acc)

    # Subtract / upcast in-kernel so the inputs stream in their native dtype.
    d = pred_ref[...].astype(jnp.float32) - targ_ref[...].astype(jnp.float32)
    pix_acc[...] += jnp.abs(d)           # pixel-domain |d| (pure VPU adds)

    # One fused (TB, N) @ (N, 2N) matmul -> [Re | Im] of the flattened 2-D DFT of
    # the difference (fft2 is linear: fft2(pred) - fft2(target) == fft2(d)).
    db = d.astype(f2_ref.dtype)
    z = jnp.dot(db, f2_ref[...], preferred_element_type=jnp.float32)  # (TB, 2N)
    zr = z[:, :n]
    zi = z[:, n:]
    freq_acc[...] += jnp.sqrt(zr * zr + zi * zi)   # |fft2(pred) - fft2(target)|

    @pl.when(i == pl.num_programs(inner_axis) - 1)
    def _finalize():
        # Row-reduce (TB, N) -> (8, N) before HBM writeback (TB/8 fewer output
        # bytes, smaller host-side sum).  Static 8-row slices are sublane-aligned.
        pix_r = pix_acc[0:8, :]
        freq_r = freq_acc[0:8, :]
        for g in range(1, tb // 8):
            pix_r = pix_r + pix_acc[g * 8:(g + 1) * 8, :]
            freq_r = freq_r + freq_acc[g * 8:(g + 1) * 8, :]
        pix_out_ref[...] = pix_r
        freq_out_ref[...] = freq_r


def _dft2_matrix(h, w, dtype):
    """(H*W, 2*H*W) matrix [Re | Im] of the flattened 2-D DFT.

    F[(y*W + x), (u*W + v)] = exp(-2j*pi*(u*y/H + v*x/W)).  Phases are reduced
    with an integer mod so cos/sin arguments stay small (f32-accurate).
    """
    yh = jnp.arange(h, dtype=jnp.int32)
    xw = jnp.arange(w, dtype=jnp.int32)
    ph_h = (yh[:, None] * yh[None, :]) % h                       # (H, H): [y, u]
    ph_w = (xw[:, None] * xw[None, :]) % w                       # (W, W): [x, v]
    frac = (ph_h.astype(jnp.float32) / h)[:, None, :, None] \
         + (ph_w.astype(jnp.float32) / w)[None, :, None, :]      # (y, x, u, v)
    ang = (-2.0 * jnp.pi) * frac
    n = h * w
    f2r = jnp.cos(ang).reshape(n, n)
    f2i = jnp.sin(ang).reshape(n, n)
    return jnp.concatenate([f2r, f2i], axis=1).astype(dtype)     # (N, 2N)


def _build_call(*, tb, n, ncores, n_inner, single_buffer_consts, cost, vmem_limit):
    const_kwargs = {}
    if single_buffer_consts:
        # The DFT matrix never changes across the grid -> one VMEM buffer.
        const_kwargs["pipeline_mode"] = pl.Buffered(1)

    if ncores == 1:
        grid = (n_inner,)
        img_spec = pl.BlockSpec((tb, n), lambda i: (i, 0))
        const_spec = pl.BlockSpec((n, 2 * n), lambda i: (0, 0), **const_kwargs)
        out_spec = pl.BlockSpec((8, n), lambda i: (0, 0))
        semantics = ("arbitrary",)
        inner_axis = 0
    else:
        grid = (ncores, n_inner)
        img_spec = pl.BlockSpec((tb, n), lambda c, i: (c * n_inner + i, 0))
        const_spec = pl.BlockSpec((n, 2 * n), lambda c, i: (0, 0), **const_kwargs)
        out_spec = pl.BlockSpec((8, n), lambda c, i: (c, 0))
        # TODO(synk): verify "parallel" shards across v7x's 2 TensorCores; if not, switch this axis to pltpu.CORE_PARALLEL (per-core outputs/scratch are already disjoint).
        semantics = ("parallel", "arbitrary")
        inner_axis = 1

    kernel = functools.partial(_l1fft_kernel, inner_axis=inner_axis, n=n, tb=tb)
    return pl.pallas_call(
        kernel,
        out_shape=(jax.ShapeDtypeStruct((ncores * 8, n), jnp.float32),
                   jax.ShapeDtypeStruct((ncores * 8, n), jnp.float32)),
        grid_spec=pltpu.PrefetchScalarGridSpec(
            num_scalar_prefetch=0,
            grid=grid,
            in_specs=[img_spec, img_spec, const_spec],
            out_specs=(out_spec, out_spec),
            scratch_shapes=[pltpu.VMEM((tb, n), jnp.float32),
                            pltpu.VMEM((tb, n), jnp.float32)]),
        compiler_params=pltpu.CompilerParams(
            dimension_semantics=semantics,
            vmem_limit_bytes=int(vmem_limit)),
        cost_estimate=cost,
    )


def l1fft_loss(pred, target, alpha=1.0, beta=1.0, reduction="mean",
               matmul_dtype=jnp.bfloat16):
    """alpha * L1(pred, target) + beta * L1(fft2(pred), fft2(target)).

    Note: the DFT matmul runs in `matmul_dtype` (default bf16 with f32
    accumulation) => ~0.5% relative error on the frequency term.  Pass
    matmul_dtype=jnp.float32 for a tighter (slower) frequency term.
    """
    if reduction == "none":
        # TODO(synk): reduction='none' (per-element pixel + frequency maps).
        raise NotImplementedError("reduction='none' not supported by the Pallas kernel")
    assert reduction in ("mean", "sum")
    # TODO(synk): custom_vjp for training use; only the forward pass is implemented.

    B, C, H, W = pred.shape
    n = H * W
    if n > _MAX_FLAT_N:
        # TODO(synk): separable F_H @ d @ F_W path with column tiling for large H*W.
        raise NotImplementedError(f"flattened-DFT kernel requires H*W <= {_MAX_FLAT_N}")

    vmem_budget, vmem_limit, ncores = _chip_config()
    bc = B * C
    ncores = max(1, min(ncores, bc))

    matmul_dtype = jnp.dtype(matmul_dtype)
    in_bytes = jnp.dtype(pred.dtype).itemsize
    const_bytes_1 = n * (2 * n) * matmul_dtype.itemsize   # one buffer of [Re|Im]

    def _vmem_need(t, const_bufs):
        # 2 native-dtype inputs double-buffered + 2 f32 scratch accumulators
        # + ~4 f32-sized fused temporaries (d, db, z, |z|) + DFT constant
        # + tiny (8, N) output blocks (double-buffered).
        return (2 * 2 * t * n * in_bytes
                + 2 * t * n * 4
                + 4 * t * n * 4
                + const_bufs * const_bytes_1
                + 2 * 2 * 8 * n * 4)

    rows_per_core = -(-bc // ncores)
    tb_cap = 1024 if n <= 1024 else 256          # big N is MXU-bound; small N wants fewer steps
    tb = min(tb_cap, _round_up(rows_per_core, 8))

    # Single-buffer the constant only when double-buffering it would actually
    # pressure the VMEM budget (keeps the common path on default pipelining).
    single_buffer_consts = _HAS_BUFFERED and (_vmem_need(tb, 2) > vmem_budget)
    const_bufs = 1 if single_buffer_consts else 2
    while tb > 8 and _vmem_need(tb, const_bufs) > vmem_budget:
        tb = max(8, (tb // 2) // 8 * 8)

    n_inner = max(1, -(-rows_per_core // tb))
    rows = ncores * n_inner * tb

    predf = pred.reshape(bc, n)        # native dtype: no host-side upcast pass
    targf = target.reshape(bc, n)
    if rows > bc:                      # zero-pad rows: d = 0 there -> contributes 0
        predf = jnp.pad(predf, ((0, rows - bc), (0, 0)))
        targf = jnp.pad(targf, ((0, rows - bc), (0, 0)))

    f2 = _dft2_matrix(H, W, matmul_dtype)        # (N, 2N) = [Re | Im]

    cost = pl.CostEstimate(
        flops=4 * rows * n * n,                  # one (rows,n) x (n,2n) real matmul
        transcendentals=rows * n,                # one sqrt per frequency bin
        bytes_accessed=(2 * rows * n * in_bytes
                        + const_bytes_1
                        + 2 * ncores * 8 * n * 4))

    pix_map, freq_map = _build_call(
        tb=tb, n=n, ncores=ncores, n_inner=n_inner,
        single_buffer_consts=single_buffer_consts,
        cost=cost, vmem_limit=vmem_limit)(predf, targf, f2)

    pix_sum = jnp.sum(pix_map)
    freq_sum = jnp.sum(freq_map)
    if reduction == "mean":
        denom = jnp.float32(B * C * H * W)
        pix, freq = pix_sum / denom, freq_sum / denom
    else:
        pix, freq = pix_sum, freq_sum
    return jnp.float32(alpha) * pix + jnp.float32(beta) * freq


if __name__ == "__main__":
    key = jax.random.PRNGKey(0)
    k1, k2, k3, k4 = jax.random.split(key, 4)

    # Case 1: (2, 4, 16, 16), mean reduction.
    B, C, H, W = 2, 4, 16, 16
    pred = jax.random.normal(k1, (B, C, H, W), dtype=jnp.float32)
    target = jax.random.normal(k2, (B, C, H, W), dtype=jnp.float32)
    out = jax.block_until_ready(
        l1fft_loss(pred, target, alpha=1.0, beta=1.0, reduction="mean"))
    pix_ref = jnp.mean(jnp.abs(pred - target))
    freq_ref = jnp.mean(jnp.abs(jnp.fft.fft2(pred) - jnp.fft.fft2(target)))
    ref = pix_ref + freq_ref
    # bf16 MXU inputs (f32 accumulation) -> slightly looser tolerance than pure f32.
    assert jnp.allclose(out, ref, rtol=1e-2, atol=1e-2), (out, ref)

    # Case 2: non-square spatial dims, padded rows, sum reduction, alpha/beta != 1.
    B2, C2, H2, W2 = 1, 3, 8, 16
    pred2 = jax.random.normal(k3, (B2, C2, H2, W2), dtype=jnp.float32)
    target2 = jax.random.normal(k4, (B2, C2, H2, W2), dtype=jnp.float32)
    out2 = jax.block_until_ready(
        l1fft_loss(pred2, target2, alpha=0.5, beta=2.0, reduction="sum"))
    ref2 = (0.5 * jnp.sum(jnp.abs(pred2 - target2))
            + 2.0 * jnp.sum(jnp.abs(jnp.fft.fft2(pred2) - jnp.fft.fft2(target2))))
    assert jnp.allclose(out2, ref2, rtol=1e-2, atol=1e-2), (out2, ref2)

    print("KERNEL_OK")
</pallas_src>

<mosaic_0001>
module attributes {stable_mosaic.version = 11 : i64} {
  func.func @_l1fft_kernel(%arg0: i32, %arg1: memref<8x256xf32, #tpu.memory_space<vmem>>, %arg2: memref<8x256xf32, #tpu.memory_space<vmem>>, %arg3: memref<256x512xbf16, #tpu.memory_space<vmem>>, %arg4: memref<8x256xf32, #tpu.memory_space<vmem>>, %arg5: memref<8x256xf32, #tpu.memory_space<vmem>>, %arg6: memref<8x256xf32, #tpu.memory_space<vmem>>, %arg7: memref<8x256xf32, #tpu.memory_space<vmem>>) attributes {dimension_semantics = [#tpu.dimension_semantics<arbitrary>], iteration_bounds = array<i64: 1>, scalar_prefetch = 0 : i64, scratch_operands = 2 : i64, tpu.core_type = #tpu.core_type<tc>, window_params = [{transform_indices = @transform_0, window_bounds = array<i64: 8, 256>}, {transform_indices = @transform_1, window_bounds = array<i64: 8, 256>}, {pipeline_mode = #tpu.pipeline_mode<synchronous>, transform_indices = @transform_2, window_bounds = array<i64: 256, 512>}, {pipeline_mode = #tpu.pipeline_mode<synchronous>, transform_indices = @transform_3, window_bounds = array<i64: 8, 256>}, {pipeline_mode = #tpu.pipeline_mode<synchronous>, transform_indices = @transform_4, window_bounds = array<i64: 8, 256>}]} {
    %c0_i32 = arith.constant 0 : i32
    %0 = arith.cmpi eq, %arg0, %c0_i32 : i32
    %1 = arith.extui %0 : i1 to i32
    %c0_i32_0 = arith.constant 0 : i32
    %2 = arith.cmpi ne, %1, %c0_i32_0 : i32
    scf.if %2 {
      %cst_16 = arith.constant 0.000000e+00 : f32
      %25 = vector.broadcast %cst_16 : f32 to vector<8x256xf32>
      %c0_17 = arith.constant 0 : index
      %c0_18 = arith.constant 0 : index
      %26 = vector.load %arg6[%c0_17, %c0_18] : memref<8x256xf32, #tpu.memory_space<vmem>>, vector<8x256xf32>
      tpu.vector_store %arg6[%c0_17, %c0_18], %25 {strides = array<i32>} : memref<8x256xf32, #tpu.memory_space<vmem>>, vector<8x256xf32>,
      %cst_19 = arith.constant 0.000000e+00 : f32
      %27 = vector.broadcast %cst_19 : f32 to vector<8x256xf32>
      %c0_20 = arith.constant 0 : index
      %c0_21 = arith.constant 0 : index
      %28 = vector.load %arg7[%c0_20, %c0_21] : memref<8x256xf32, #tpu.memory_space<vmem>>, vector<8x256xf32>
      tpu.vector_store %arg7[%c0_20, %c0_21], %27 {strides = array<i32>} : memref<8x256xf32, #tpu.memory_space<vmem>>, vector<8x256xf32>,
    } else {
    }
    %c0 = arith.constant 0 : index
    %c0_1 = arith.constant 0 : index
    %3 = vector.load %arg1[%c0, %c0_1] : memref<8x256xf32, #tpu.memory_space<vmem>>, vector<8x256xf32>
    %c0_2 = arith.constant 0 : index
    %c0_3 = arith.constant 0 : index
    %4 = vector.load %arg2[%c0_2, %c0_3] : memref<8x256xf32, #tpu.memory_space<vmem>>, vector<8x256xf32>
    %5 = arith.subf %3, %4 : vector<8x256xf32>
    %c0_4 = arith.constant 0 : index
    %c0_5 = arith.constant 0 : index
    %6 = vector.load %arg6[%c0_4, %c0_5] : memref<8x256xf32, #tpu.memory_space<vmem>>, vector<8x256xf32>
    %7 = math.absf %5 : vector<8x256xf32>
    %8 = arith.addf %6, %7 : vector<8x256xf32>
    %c0_6 = arith.constant 0 : index
    %c0_7 = arith.constant 0 : index
    %9 = vector.load %arg6[%c0_6, %c0_7] : memref<8x256xf32, #tpu.memory_space<vmem>>, vector<8x256xf32>
    tpu.vector_store %arg6[%c0_6, %c0_7], %8 {strides = array<i32>} : memref<8x256xf32, #tpu.memory_space<vmem>>, vector<8x256xf32>,
    %10 = arith.truncf %5 : vector<8x256xf32> to vector<8x256xbf16>
    %c0_8 = arith.constant 0 : index
    %c0_9 = arith.constant 0 : index
    %11 = vector.load %arg3[%c0_8, %c0_9] : memref<256x512xbf16, #tpu.memory_space<vmem>>, vector<256x512xbf16>
    %cst = arith.constant dense<0.000000e+00> : vector<8x512xf32>
    %12 = tpu.matmul %10, %11, %cst {dimension_numbers = #tpu.dot_dimension_numbers<[1], [0], [0], [1], [0, 0, 1, 1], [], []>} : vector<8x256xbf16>, vector<256x512xbf16>, vector<8x512xf32> -> vector<8x512xf32>
    %13 = vector.extract_strided_slice %12 {offsets = [0, 0], sizes = [8, 256], strides = [1, 1]} : vector<8x512xf32> to vector<8x256xf32>
    %14 = vector.extract_strided_slice %12 {offsets = [0, 256], sizes = [8, 256], strides = [1, 1]} : vector<8x512xf32> to vector<8x256xf32>
    %c0_10 = arith.constant 0 : index
    %c0_11 = arith.constant 0 : index
    %15 = vector.load %arg7[%c0_10, %c0_11] : memref<8x256xf32, #tpu.memory_space<vmem>>, vector<8x256xf32>
    %16 = arith.mulf %13, %13 : vector<8x256xf32>
    %17 = arith.mulf %14, %14 : vector<8x256xf32>
    %18 = arith.addf %16, %17 : vector<8x256xf32>
    %19 = math.sqrt %18 : vector<8x256xf32>
    %20 = arith.addf %15, %19 : vector<8x256xf32>
    %c0_12 = arith.constant 0 : index
    %c0_13 = arith.constant 0 : index
    %21 = vector.load %arg7[%c0_12, %c0_13] : memref<8x256xf32, #tpu.memory_space<vmem>>, vector<8x256xf32>
    tpu.vector_store %arg7[%c0_12, %c0_13], %20 {strides = array<i32>} : memref<8x256xf32, #tpu.memory_space<vmem>>, vector<8x256xf32>,
    %c0_i32_14 = arith.constant 0 : i32
    %22 = arith.cmpi eq, %arg0, %c0_i32_14 : i32
    %23 = arith.extui %22 : i1 to i32
    %c0_i32_15 = arith.constant 0 : i32
    %24 = arith.cmpi ne, %23, %c0_i32_15 : i32
    scf.if %24 {
      %c0_16 = arith.constant 0 : index
      %c0_17 = arith.constant 0 : index
      %25 = vector.load %arg6[%c0_16, %c0_17] : memref<8x256xf32, #tpu.memory_space<vmem>>, vector<8x256xf32>
      %c0_18 = arith.constant 0 : index
      %c0_19 = arith.constant 0 : index
      %26 = vector.load %arg7[%c0_18, %c0_19] : memref<8x256xf32, #tpu.memory_space<vmem>>, vector<8x256xf32>
      %c0_20 = arith.constant 0 : index
      %c0_21 = arith.constant 0 : index
      %27 = vector.load %arg4[%c0_20, %c0_21] : memref<8x256xf32, #tpu.memory_space<vmem>>, vector<8x256xf32>
      tpu.vector_store %arg4[%c0_20, %c0_21], %25 {strides = array<i32>} : memref<8x256xf32, #tpu.memory_space<vmem>>, vector<8x256xf32>,
      %c0_22 = arith.constant 0 : index
      %c0_23 = arith.constant 0 : index
      %28 = vector.load %arg5[%c0_22, %c0_23] : memref<8x256xf32, #tpu.memory_space<vmem>>, vector<8x256xf32>
      tpu.vector_store %arg5[%c0_22, %c0_23], %26 {strides = array<i32>} : memref<8x256xf32, #tpu.memory_space<vmem>>, vector<8x256xf32>,
    } else {
    }
    return
  }
  func.func @transform_0(%arg0: i32) -> (i32, i32) {
    %c0_i32 = arith.constant 0 : i32
    %c0_i32_0 = arith.constant 0 : i32
    return %arg0, %c0_i32 : i32, i32
  }
  func.func @transform_1(%arg0: i32) -> (i32, i32) {
    %c0_i32 = arith.constant 0 : i32
    %c0_i32_0 = arith.constant 0 : i32
    return %arg0, %c0_i32 : i32, i32
  }
  func.func @transform_2(%arg0: i32) -> (i32, i32) {
    %c0_i32 = arith.constant 0 : i32
    %c0_i32_0 = arith.constant 0 : i32
    %c0_i32_1 = arith.constant 0 : i32
    return %c0_i32, %c0_i32_0 : i32, i32
  }
  func.func @transform_3(%arg0: i32) -> (i32, i32) {
    %c0_i32 = arith.constant 0 : i32
    %c0_i32_0 = arith.constant 0 : i32
    %c0_i32_1 = arith.constant 0 : i32
    return %c0_i32, %c0_i32_0 : i32, i32
  }
  func.func @transform_4(%arg0: i32) -> (i32, i32) {
    %c0_i32 = arith.constant 0 : i32
    %c0_i32_0 = arith.constant 0 : i32
    %c0_i32_1 = arith.constant 0 : i32
    return %c0_i32, %c0_i32_0 : i32, i32
  }
}

</mosaic_0001>

<bundles_post_ra>
// kernel: tpu_custom_call.1
= control target key start
LH: loop header
LB: loop body
LE: loop exit
PB: predicated region body
PF: predicated region fallthrough
CT: control target
= control target key end

     0   :  { %10 = vsyncpa [#allocation5], 0  ;;  %s938_s0 = inlined_call_operand.hbm [shape: f32[8,256], index: 0, kind: input, shape index: {}]   ;;  %s939_s1 = inlined_call_operand.hbm [shape: f32[8,256], index: 1, kind: input, shape index: {}]   ;;  %s940_s2 = inlined_call_operand.hbm [shape: bf16[256,512], index: 2, kind: input, shape index: {}]   ;;  %s941_s3 = inlined_call_operand.hbm [shape: f32[8,256], index: 3, kind: output, shape index: {0}]   ;;  %s942_s4 = inlined_call_operand.hbm [shape: f32[8,256], index: 4, kind: output, shape index: {1}]  }
   0x1   :  { %11 = vsyncpa [#allocation8], 0 }
   0x2   :  { %12 = vsyncpa [#allocation6], 0 }
   0x3   :  { %13 = vsyncpa [#allocation12], 0  ;;  %s891_s15 = smov [#allocation7]   ;;  %s892_s17 = smov [#allocation4]  }
   0x4   :  { %s30_s16 = sshll.u32 %s891_s15, 4  ;;  %s20_s18 = sshll.u32 %s892_s17, 4  ;;  %s31_s16 = int_to_ptr.vmem [resolvable:$true] %s30_s16  ;;  %s21_s18 = int_to_ptr.vmem [resolvable:$true] %s20_s18 }
   0x5   :  { %s791_s19 = scalar_lea.vmem %s31_s16, 256  ;;  %p796_p1 = scmp.lt.s32.totalorder %s31_s16, %s31_s16 }
   0x6   :  { %p792_p0 = scmp.ne.s32.totalorder %s31_s16, %s791_s19  ;;  %p797_p2 = scmp.lt.s32.totalorder %s791_s19, %s791_s19 }
   0x8   :  { %p798_p3 = por %p797_p2, %p796_p1 }
   0xa   :  { %p799_p4 = pnand %p798_p3, %p792_p0 }
   0xc   :  { %802 = shalt.err (!%p799_p4)
}
   0xd   :  { %33 = dma.hbm_to_vmem [thread:$0]  %s939_s1, 256, %s31_s16, [#allocation8]  }
   0xe   :  { %s811_s22 = scalar_lea.vmem %s21_s18, 256  ;;  %p816_p6 = scmp.lt.s32.totalorder %s21_s18, %s21_s18 }
   0xf   :  { %p812_p5 = scmp.ne.s32.totalorder %s21_s18, %s811_s22  ;;  %p817_p7 = scmp.lt.s32.totalorder %s811_s22, %s811_s22 }
  0x11   :  { %p818_p8 = por %p817_p7, %p816_p6 }
  0x13   :  { %p819_p9 = pnand %p818_p8, %p812_p5 }
  0x15   :  { %822 = shalt.err (!%p819_p9)
}
  0x16   :  { %23 = dma.hbm_to_vmem [thread:$0]  %s938_s0, 256, %s21_s18, [#allocation5]  }
  0x17   :  { %s893_s25 = smov [#allocation9]  }
  0x18   :  { %s39_s26 = sshll.u32 %s893_s25, 4  ;;  %s40_s26 = int_to_ptr.vmem [resolvable:$true] %s39_s26 }
  0x19   :  { %s831_s27 = scalar_lea.vmem %s40_s26, 8192  ;;  %p836_p11 = scmp.lt.s32.totalorder %s40_s26, %s40_s26 }
  0x1a   :  { %p832_p10 = scmp.ne.s32.totalorder %s40_s26, %s831_s27  ;;  %p837_p12 = scmp.lt.s32.totalorder %s831_s27, %s831_s27 }
  0x1c   :  { %p838_p13 = por %p837_p12, %p836_p11 }
  0x1e   :  { %p839_p0 = pnand %p838_p13, %p832_p10 }
  0x20   :  { %842 = shalt.err (!%p839_p0)
}
  0x21   :  { %s894_s1 = smov 256   ;;  %s895_s28 = smov 16  }
  0x22   :  { %45 = dma.hbm_to_vmem [thread:$0]  %s940_s2, 8192, %s40_s26, [#allocation8], %s894_s1, %s894_s1, %s895_s28  }
  0x23   :  { %883 = dma.done.wait [#allocation5], 256  }
  0x24   :  { %884 = vsyncadd [#allocation5], 4294967040 }
  0x25   :  { %885 = dma.done.wait [#allocation8], 8448  }
  0x26   :  { %886 = vsyncadd [#allocation8], 4294958848  ;;  %v683_v0 = vld [vmem:[#allocation9 + $0xe4] ss:$16 sps:$4 sm:$0xff]   ;;  %v685_v1 = vld [vmem:[#allocation9 + $0xec] ss:$16 sps:$4 sm:$0xff]  }
  0x27   :  { %463 = vmatprep.subr.bf16.mxu0 %v683_v0  ;;  %v687_v2 = vld [vmem:[#allocation9 + $0xe0] ss:$16 sps:$4 sm:$0xff]   ;;  %v688_v3 = vld [vmem:[#allocation9 + $0xe8] ss:$16 sps:$4 sm:$0xff]   ;;  %504 = vmatprep.subr.bf16.mxu1 %v685_v1  ;;  %v689_v4 = vld [vmem:[#allocation9 + $0xc4] ss:$16 sps:$4 sm:$0xff]  }
  0x28   :  { %464 = vmatpush1.bf16.msra.mxu0 %v687_v2  ;;  %505 = vmatpush1.bf16.msra.mxu1 %v688_v3  ;;  %v691_v5 = vld [vmem:[#allocation9 + $0xcc] ss:$16 sps:$4 sm:$0xff]   ;;  %v693_v6 = vld [vmem:[#allocation9 + $0xc0] ss:$16 sps:$4 sm:$0xff]   ;;  %v694_v7 = vld [vmem:[#allocation9 + $0xc8] ss:$16 sps:$4 sm:$0xff]  }
  0x29   :  { %465 = vmatprep.subr.bf16.mxu0 %v689_v4  ;;  %506 = vmatprep.subr.bf16.mxu1 %v691_v5  ;;  %v695_v8 = vld [vmem:[#allocation9 + $0xa4] ss:$16 sps:$4 sm:$0xff]   ;;  %v697_v9 = vld [vmem:[#allocation9 + $0xac] ss:$16 sps:$4 sm:$0xff]   ;;  %v699_v10 = vld [vmem:[#allocation9 + $0xa0] ss:$16 sps:$4 sm:$0xff]  }
  0x2a   :  { %v700_v11 = vld [vmem:[#allocation9 + $0xa8] ss:$16 sps:$4 sm:$0xff]   ;;  %v701_v12 = vld [vmem:[#allocation9 + $0x84] ss:$16 sps:$4 sm:$0xff]   ;;  %v703_v13 = vld [vmem:[#allocation9 + $0x8c] ss:$16 sps:$4 sm:$0xff]  }
  0x2b   :  { %v705_v14 = vld [vmem:[#allocation9 + $0x80] ss:$16 sps:$4 sm:$0xff]   ;;  %v706_v15 = vld [vmem:[#allocation9 + $0x88] ss:$16 sps:$4 sm:$0xff]   ;;  %v707_v16 = vld [vmem:[#allocation9 + $0x64] ss:$16 sps:$4 sm:$0xff]  }
  0x2c   :  { %466 = vmatpush1.bf16.msra.mxu0 %v693_v6  ;;  %507 = vmatpush1.bf16.msra.mxu1 %v694_v7  ;;  %v709_v17 = vld [vmem:[#allocation9 + $0x6c] ss:$16 sps:$4 sm:$0xff]   ;;  %v711_v18 = vld [vmem:[#allocation9 + $0x60] ss:$16 sps:$4 sm:$0xff]   ;;  %v712_v19 = vld [vmem:[#allocation9 + $0x68] ss:$16 sps:$4 sm:$0xff]  }
  0x2d   :  { %467 = vmatprep.subr.bf16.mxu0 %v695_v8  ;;  %508 = vmatprep.subr.bf16.mxu1 %v697_v9  ;;  %v713_v20 = vld [vmem:[#allocation9 + $0x44] ss:$16 sps:$4 sm:$0xff]   ;;  %v715_v21 = vld [vmem:[#allocation9 + $0x4c] ss:$16 sps:$4 sm:$0xff]   ;;  %v717_v22 = vld [vmem:[#allocation9 + $0x40] ss:$16 sps:$4 sm:$0xff]  }
  0x2e   :  { %v718_v23 = vld [vmem:[#allocation9 + $0x48] ss:$16 sps:$4 sm:$0xff]   ;;  %v719_v24 = vld [vmem:[#allocation9 + $0x24] ss:$16 sps:$4 sm:$0xff]   ;;  %v721_v25 = vld [vmem:[#allocation9 + $0x2c] ss:$16 sps:$4 sm:$0xff]  }
  0x2f   :  { %v723_v26 = vld [vmem:[#allocation9 + $0x20] ss:$16 sps:$4 sm:$0xff]   ;;  %v724_v27 = vld [vmem:[#allocation9 + $0x28] ss:$16 sps:$4 sm:$0xff]   ;;  %v725_v28 = vld [vmem:[#allocation9 + $0x4] ss:$16 sps:$4 sm:$0xff]  }
  0x30   :  { %468 = vmatpush1.bf16.msra.mxu0 %v699_v10  ;;  %509 = vmatpush1.bf16.msra.mxu1 %v700_v11  ;;  %v727_v29 = vld [vmem:[#allocation9 + $0xc] ss:$16 sps:$4 sm:$0xff]   ;;  %v729_v30 = vld [vmem:[#allocation9] ss:$16 sps:$4 sm:$0xff]   ;;  %v730_v31 = vld [vmem:[#allocation9 + $0x8] ss:$16 sps:$4 sm:$0xff]  }
  0x31   :  { %469 = vmatprep.subr.bf16.mxu0 %v701_v12  ;;  %510 = vmatprep.subr.bf16.mxu1 %v703_v13  ;;  %v731_v32 = vld [vmem:[#allocation9 + $0x1e4] ss:$16 sps:$4 sm:$0xff]   ;;  %v733_v33 = vld [vmem:[#allocation9 + $0x1ec] ss:$16 sps:$4 sm:$0xff]   ;;  %v735_v34 = vld [vmem:[#allocation9 + $0x1e0] ss:$16 sps:$4 sm:$0xff]  }
  0x32   :  { %v736_v35 = vld [vmem:[#allocation9 + $0x1e8] ss:$16 sps:$4 sm:$0xff]   ;;  %v737_v36 = vld [vmem:[#allocation9 + $0x1c4] ss:$16 sps:$4 sm:$0xff]   ;;  %v739_v37 = vld [vmem:[#allocation9 + $0x1cc] ss:$16 sps:$4 sm:$0xff]  }
  0x33   :  { %v741_v38 = vld [vmem:[#allocation9 + $0x1c0] ss:$16 sps:$4 sm:$0xff]   ;;  %v742_v39 = vld [vmem:[#allocation9 + $0x1c8] ss:$16 sps:$4 sm:$0xff]   ;;  %v743_v40 = vld [vmem:[#allocation9 + $0x1a4] ss:$16 sps:$4 sm:$0xff]  }
  0x34   :  { %470 = vmatpush1.bf16.msra.mxu0 %v705_v14  ;;  %511 = vmatpush1.bf16.msra.mxu1 %v706_v15  ;;  %v745_v41 = vld [vmem:[#allocation9 + $0x1ac] ss:$16 sps:$4 sm:$0xff]   ;;  %v747_v42 = vld [vmem:[#allocation9 + $0x1a0] ss:$16 sps:$4 sm:$0xff]   ;;  %v748_v43 = vld [vmem:[#allocation9 + $0x1a8] ss:$16 sps:$4 sm:$0xff]  }
  0x35   :  { %471 = vmatprep.subr.bf16.mxu0 %v707_v16  ;;  %512 = vmatprep.subr.bf16.mxu1 %v709_v17  ;;  %v749_v44 = vld [vmem:[#allocation9 + $0x184] ss:$16 sps:$4 sm:$0xff]   ;;  %v751_v45 = vld [vmem:[#allocation9 + $0x18c] ss:$16 sps:$4 sm:$0xff]   ;;  %v753_v48 = vld [vmem:[#allocation9 + $0x180] ss:$16 sps:$4 sm:$0xff]  }
  0x36   :  { %v64_v46 = vld [vmem:[#allocation4 + $0x8] sm:$0xff]  ;;  %v66_v47 = vld [vmem:[#allocation7 + $0x8] sm:$0xff]  ;;  %v755_v51 = vld [vmem:[#allocation9 + $0x164] ss:$16 sps:$4 sm:$0xff]   ;;  %s896_s0 = smov [#allocation10]  }
  0x37   :  { %v754_v49 = vld [vmem:[#allocation9 + $0x188] ss:$16 sps:$4 sm:$0xff]   ;;  %v68_v50 = vsub.f32 %v64_v46, %v66_v47  ;;  %v757_v52 = vld [vmem:[#allocation9 + $0x16c] ss:$16 sps:$4 sm:$0xff]   ;;  %v759_v54 = vld [vmem:[#allocation9 + $0x160] ss:$16 sps:$4 sm:$0xff]  }
  0x38   :  { %472 = vmatpush1.bf16.msra.mxu0 %v711_v18  ;;  %513 = vmatpush1.bf16.msra.mxu1 %v712_v19  ;;  %v760_v55 = vld [vmem:[#allocation9 + $0x168] ss:$16 sps:$4 sm:$0xff]   ;;  %v761_v56 = vld [vmem:[#allocation9 + $0x144] ss:$16 sps:$4 sm:$0xff]   ;;  %v763_v57 = vld [vmem:[#allocation9 + $0x14c] ss:$16 sps:$4 sm:$0xff]  }
  0x39   :  { %473 = vmatprep.subr.bf16.mxu0 %v713_v20  ;;  %514 = vmatprep.subr.bf16.mxu1 %v715_v21  ;;  %v78_v53 = vpack.c.bf16 %v68_v50, %v68_v50  ;;  %v765_v58 = vld [vmem:[#allocation9 + $0x140] ss:$16 sps:$4 sm:$0xff]   ;;  %v766_v59 = vld [vmem:[#allocation9 + $0x148] ss:$16 sps:$4 sm:$0xff]   ;;  %v767_v60 = vld [vmem:[#allocation9 + $0x124] ss:$16 sps:$4 sm:$0xff]  }
  0x3a   :  { %v769_v61 = vld [vmem:[#allocation9 + $0x12c] ss:$16 sps:$4 sm:$0xff]   ;;  %v771_v62 = vld [vmem:[#allocation9 + $0x120] ss:$16 sps:$4 sm:$0xff]   ;;  %v772_v63 = vld [vmem:[#allocation9 + $0x128] ss:$16 sps:$4 sm:$0xff]  }
  0x3b   :  { %495 = vmatprep.mubr.bf16.mxu0 %v78_v53  ;;  %536 = vmatprep.mubr.bf16.mxu1 %v78_v53  ;;  %v63_v0 = vld [vmem:[#allocation4] sm:$0xff]  ;;  %v65_v1 = vld [vmem:[#allocation7] sm:$0xff]  ;;  %v775_v3 = vld [vmem:[#allocation9 + $0x10c] ss:$16 sps:$4 sm:$0xff]   ;;  %v72_v9 = vand.u32 2147483647, %v68_v50 }
  0x3c   :  { %474 = vmatpush1.bf16.msra.mxu0 %v717_v22  ;;  %515 = vmatpush1.bf16.msra.mxu1 %v718_v23  ;;  %v773_v2 = vld [vmem:[#allocation9 + $0x104] ss:$16 sps:$4 sm:$0xff]   ;;  %v67_v4 = vsub.f32 %v63_v0, %v65_v1  ;;  %v777_v5 = vld [vmem:[#allocation9 + $0x100] ss:$16 sps:$4 sm:$0xff]   ;;  %v778_v6 = vld [vmem:[#allocation9 + $0x108] ss:$16 sps:$4 sm:$0xff]  }
  0x3d   :  { %475 = vmatprep.subr.bf16.mxu0 %v719_v24  ;;  %516 = vmatprep.subr.bf16.mxu1 %v721_v25  ;;  %s588_s2 = sshll.u32 %s896_s0, 4  ;;  %579 = vst [vmem:[#allocation10 + $0x8] sm:$0xff] %v72_v9  ;;  %s589_s2 = int_to_ptr.vmem [resolvable:$true] %s588_s2 }
  0x3e   :  { %v77_v7 = vpack.c.bf16 %v67_v4, %v67_v4  ;;  %v71_v8 = vand.u32 2147483647, %v67_v4  ;;  %s843_s5 = scalar_lea.vmem %s589_s2, 256  ;;  %p848_p2 = scmp.lt.s32.totalorder %s589_s2, %s589_s2 }
  0x3f   :  { %p844_p1 = scmp.ne.s32.totalorder %s589_s2, %s843_s5  ;;  %p849_p3 = scmp.lt.s32.totalorder %s843_s5, %s843_s5 }
  0x40   :  { %476 = vmatpush1.bf16.msra.mxu0 %v723_v26  ;;  %517 = vmatpush1.bf16.msra.mxu1 %v724_v27  ;;  %578 = vst [vmem:[#allocation10] sm:$0xff] %v71_v8 }
  0x41   :  { %477 = vmatprep.subr.bf16.mxu0 %v725_v28  ;;  %518 = vmatprep.subr.bf16.mxu1 %v727_v29  ;;  %p850_p4 = por %p849_p3, %p848_p2 }
  0x43   :  { %p851_p5 = pnand %p850_p4, %p844_p1 }
  0x44   :  { %478 = vmatpush1.bf16.msra.mxu0 %v729_v30  ;;  %519 = vmatpush1.bf16.msra.mxu1 %v730_v31 }
  0x45   :  { %479 = vmatprep.subr.bf16.mxu0 %v731_v32  ;;  %520 = vmatprep.subr.bf16.mxu1 %v733_v33 }
  0x48   :  { %480 = vmatpush2.bf16.msra.mxu0 %v735_v34  ;;  %521 = vmatpush2.bf16.msra.mxu1 %v736_v35 }
  0x49   :  { %481 = vmatprep.subr.bf16.mxu0 %v737_v36  ;;  %522 = vmatprep.subr.bf16.mxu1 %v739_v37 }
  0x4c   :  { %482 = vmatpush2.bf16.msra.mxu0 %v741_v38  ;;  %523 = vmatpush2.bf16.msra.mxu1 %v742_v39 }
  0x4d   :  { %483 = vmatprep.subr.bf16.mxu0 %v743_v40  ;;  %524 = vmatprep.subr.bf16.mxu1 %v745_v41 }
  0x50   :  { %484 = vmatpush2.bf16.msra.mxu0 %v747_v42  ;;  %525 = vmatpush2.bf16.msra.mxu1 %v748_v43 }
  0x51   :  { %485 = vmatprep.subr.bf16.mxu0 %v749_v44  ;;  %526 = vmatprep.subr.bf16.mxu1 %v751_v45 }
  0x54   :  { %486 = vmatpush2.bf16.msra.mxu0 %v753_v48  ;;  %527 = vmatpush2.bf16.msra.mxu1 %v754_v49 }
  0x55   :  { %487 = vmatprep.subr.bf16.mxu0 %v755_v51  ;;  %528 = vmatprep.subr.bf16.mxu1 %v757_v52 }
  0x58   :  { %488 = vmatpush2.bf16.msra.mxu0 %v759_v54  ;;  %529 = vmatpush2.bf16.msra.mxu1 %v760_v55 }
  0x59   :  { %489 = vmatprep.subr.bf16.mxu0 %v761_v56  ;;  %530 = vmatprep.subr.bf16.mxu1 %v763_v57 }
  0x5c   :  { %490 = vmatpush2.bf16.msra.mxu0 %v765_v58  ;;  %531 = vmatpush2.bf16.msra.mxu1 %v766_v59 }
  0x5d   :  { %491 = vmatprep.subr.bf16.mxu0 %v767_v60  ;;  %532 = vmatprep.subr.bf16.mxu1 %v769_v61 }
  0x60   :  { %492 = vmatpush2.bf16.msra.mxu0 %v771_v62  ;;  %533 = vmatpush2.bf16.msra.mxu1 %v772_v63 }
  0x61   :  { %493 = vmatprep.subr.bf16.mxu0 %v773_v2  ;;  %534 = vmatprep.subr.bf16.mxu1 %v775_v3 }
  0x64   :  { %494 = vmatpush2.bf16.msra.mxu0 %v777_v5  ;;  %535 = vmatpush2.bf16.msra.mxu1 %v778_v6 }
  0x67   :  { %496 = vmatmul.mubr.bf16.vlgmr.msra.gmra.mxu0 %v77_v7  ;;  %537 = vmatmul.mubr.bf16.vlgmr.msra.gmra.mxu1 %v77_v7 }
  0x68   :  { %854 = shalt.err (!%p851_p5)
}
  0x69   :  { %591 = dma.vmem_to_hbm [thread:$0]  %s589_s2, 256, %s941_s3, [#allocation6]  }
  0x6a   :  { %s897_s3 = smov [#allocation11]  }
  0x6b   :  { %s598_s8 = sshll.u32 %s897_s3, 4  ;;  %s599_s8 = int_to_ptr.vmem [resolvable:$true] %s598_s8 }
  0x6c   :  { %s863_s9 = scalar_lea.vmem %s599_s8, 256  ;;  %p868_p7 = scmp.lt.s32.totalorder %s599_s8, %s599_s8 }
  0x6d   :  { %p864_p6 = scmp.ne.s32.totalorder %s599_s8, %s863_s9  ;;  %p869_p8 = scmp.lt.s32.totalorder %s863_s9, %s863_s9 }
  0x6f   :  { %p870_p9 = por %p869_p8, %p868_p7 }
  0x71   :  { %p871_p10 = pnand %p870_p9, %p864_p6 }
 0x127   :  { %v497_v10 = vpop.f32.mrf.mxu0  ;;  %v538_v11 = vpop.f32.mrf.mxu1 }
 0x128   :  { %v547_v12 = vmul.f32 %v497_v10, %v497_v10  ;;  %v549_v13 = vmul.f32 %v538_v11, %v538_v11 }
 0x129   :  { %v499_v14 = vpop.f32.mrf.mxu0  ;;  %v540_v15 = vpop.f32.mrf.mxu1 }
 0x12a   :  { %v551_v16 = vadd.f32 %v549_v13, %v547_v12  ;;  %v548_v17 = vmul.f32 %v499_v14, %v499_v14  ;;  %v550_v18 = vmul.f32 %v540_v15, %v540_v15 }
 0x12b   :  { %v501_v19 = vpop.f32.mrf.mxu0  ;;  %v542_v20 = vpop.f32.mrf.mxu1 }
 0x12c   :  { %779 = vrsqrt.f32 %v551_v16  ;;  %v552_v21 = vadd.f32 %v550_v18, %v548_v17  ;;  %vm555_vm0 = vcmp.eq.f32.partialorder %v551_v16, inf  ;;  %v558_v27 = vand.u32 2147483648, %v551_v16 }
 0x12d   :  { %v502_v22 = vpop.f32.mrf.mxu0  ;;  %v543_v23 = vpop.f32.mrf.mxu1  ;;  %vm557_vm1 = vcmp.eq.f32.partialorder %v551_v16, 0.0 }
 0x12e   :  { %781 = vrsqrt.f32 %v552_v21  ;;  %vm562_vm2 = vcmp.eq.f32.partialorder %v552_v21, inf  ;;  %v565_v31 = vand.u32 2147483648, %v552_v21  ;;  %vm564_vm3 = vcmp.eq.f32.partialorder %v552_v21, 0.0 }
 0x139   :  { %v780_v24 = vpop.eup %779 }
 0x13a   :  { %v554_v25 = vmul.f32 %v780_v24, %v551_v16 }
 0x13b   :  { %v782_v26 = vpop.eup %781 }
 0x13c   :  { %v556_v28 = vsel %vm555_vm0, %v551_v16, %v554_v25  ;;  %v561_v29 = vmul.f32 %v782_v26, %v552_v21 }
 0x13d   :  { %v559_v30 = vsel %vm557_vm1, %v558_v27, %v556_v28 }
 0x13e   :  { %v563_v32 = vsel %vm562_vm2, %v552_v21, %v561_v29  ;;  %580 = vst [vmem:[#allocation11] sm:$0xff] %v559_v30 }
 0x13f   :  { %v566_v33 = vsel %vm564_vm3, %v565_v31, %v563_v32 }
 0x140   :  { %581 = vst [vmem:[#allocation11 + $0x8] sm:$0xff] %v566_v33 }
 0x141   :  { %874 = shalt.err (!%p871_p10)
}
 0x142   :  { %601 = dma.vmem_to_hbm [thread:$0]  %s599_s8, 256, %s942_s4, [#allocation12]  }
 0x143   :  { %887 = dma.done.wait [#allocation6], 256  }
 0x144   :  { %888 = vsyncadd [#allocation6], 4294967040 }
 0x145   :  { %889 = dma.done.wait [#allocation12], 256  }
 0x146   :  { %890 = vsyncadd [#allocation12], 4294967040 }
 0x147   :  { %608 = vsyncpa [#allocation5], 1 }
 0x148   :  { %609 = vsyncpa [#allocation8], 1 }
 0x149   :  { %610 = vsyncpa [#allocation6], 1 }
 0x14a   :  { %611 = vsyncpa [#allocation12], 1 }

</bundles_post_ra>
